<compile_context>
chip_gen: v6e
topology: v6e:2x2x1
jax: 0.10.0
libtpu: 0.0.40
codegen_flags: <defaults>
</compile_context>

<pallas_src>
import functools

import jax
import jax.numpy as jnp
from jax import lax
from jax.experimental import pallas as pl
from jax.experimental.pallas import tpu as pltpu


def _lsd_kernel(chunks_ref, basis_ref, out_ref, *, n_frames, cp, hop, k, freq):
    """Per-batch log-spectral-distortion per-frame sums.

    chunks_ref: (1, 2*cp+16, hop) bf16 -- rows [0,cp) input chunks,
                rows [cp,2cp) target chunks, 16 zero tail rows.
    basis_ref : (n_fft, n_fft) bf16 windowed rDFT basis (hann folded in).
    out_ref   : (1, 1, cp) f32, per-frame sum over freq of ln(qi/qt)^2
                (padded frame rows written as 0).
    """
    c = chunks_ref[0]                                        # (2cp+16, hop) bf16
    rows = 2 * cp

    # Z[f] = sum_m chunk[f+m] @ basis[m*hop:(m+1)*hop]   (f32 accumulation).
    # The shift-by-m is a static f32 row slice of the matmul output (cheap
    # sublane relayout); the 16 zero tail rows keep every slice in bounds.
    z = None
    for m in range(k):
        pm = jnp.dot(c, basis_ref[m * hop:(m + 1) * hop, :],
                     preferred_element_type=jnp.float32)     # (2cp+16, 2F)
        zm = pm[m:m + rows]                                  # rows f -> chunk f+m
        z = zm if z is None else z + zm                      # (2cp, 2F)

    lane0 = lax.broadcasted_iota(jnp.int32, (cp, freq), 1) == 0

    def per_bin_power(zs):
        # zs: (cp, 2F).  cols [0,F): real bins 0..F-1; col F: Nyquist real;
        # cols (F,2F): imag bins 1..F-1.
        lo = zs[:, :freq]
        hi = zs[:, freq:]
        h2 = hi * hi
        p_main = lo * lo + jnp.where(lane0, 0.0, h2)         # bins 0..F-1
        # Nyquist bin relayouted lane-dense so its log cost is negligible.
        p_nyq = jnp.sum(jnp.where(lane0, h2, 0.0), axis=-1).reshape(1, cp)
        return p_main, p_nyq

    pi_m, pi_n = per_bin_power(z[:cp])                       # input spectrum
    pt_m, pt_n = per_bin_power(z[cp:rows])                   # target spectrum

    # ln power ratio; the 10/ln(10) dB factor is hoisted to the wrapper.
    d_m = jnp.log(pi_m + 1e-5) - jnp.log(pt_m + 1e-5)        # (cp, F)  EUP
    d_n = jnp.log(pi_n + 1e-5) - jnp.log(pt_n + 1e-5)        # (1, cp)  ~free

    s = jnp.sum(d_m * d_m, axis=-1).reshape(1, cp) + d_n * d_n
    mask = lax.broadcasted_iota(jnp.int32, (1, cp), 1) < n_frames
    out_ref[...] = jnp.where(mask, s, 0.0).reshape(1, 1, cp)


def _windowed_rdft_basis(n_fft):
    """(n_fft, n_fft) bf16 basis = hann * [cos bins 0..F-1 | Nyquist | -sin bins 1..F-1]."""
    freq = n_fft // 2
    n = jnp.arange(n_fft, dtype=jnp.float32)
    w = 0.5 - 0.5 * jnp.cos(2.0 * jnp.pi * n / n_fft)          # periodic hann
    tk = (jnp.arange(n_fft)[:, None] * jnp.arange(freq)[None, :]) % n_fft
    ang = (2.0 * jnp.pi / n_fft) * tk.astype(jnp.float32)
    cos_m = jnp.cos(ang)                                       # real parts, bins 0..F-1
    sin_m = -jnp.sin(ang)                                      # imag parts, bins 0..F-1
    alt = jnp.where(jnp.arange(n_fft) % 2 == 0, 1.0, -1.0)     # (-1)^n -> Nyquist real
    sin_m = sin_m.at[:, 0].set(alt)                            # reuse dead sin(k=0) column
    basis = w[:, None] * jnp.concatenate([cos_m, sin_m], axis=1)
    return basis.astype(jnp.bfloat16)


def _chunks(audio, n_fft, hop, n_frames, k, cp):
    """Non-overlapping bf16 (chunks, hop) rows of the reflect-padded audio."""
    pad = n_fft // 2
    x = jnp.pad(audio.astype(jnp.bfloat16), ((0, 0), (pad, pad)), mode="reflect")
    n_real = n_frames + k - 1                                  # chunks actually referenced
    x = x[:, :n_real * hop].reshape(audio.shape[0], n_real, hop)
    return jnp.pad(x, ((0, 0), (0, cp - n_real), (0, 0)))      # zero rows -> masked frames


def log_spec_distortion(input_audio, target_audio, *, n_fft=2048, hop_length=1024,
                        win_length=None):
    if win_length is None:
        win_length = n_fft
    assert win_length == n_fft  # TODO(synk): centered window padding for win_length < n_fft
    assert n_fft % 256 == 0, "n_fft//2 must be a multiple of 128 (lane alignment)"
    assert hop_length % 128 == 0 and n_fft % hop_length == 0
    hop = hop_length
    k = n_fft // hop
    b, length = input_audio.shape
    assert target_audio.shape == input_audio.shape

    n_frames = 1 + length // hop                       # center=True frame count
    cp = -(-(n_frames + k - 1) // 16) * 16             # chunk rows per signal (bf16 tile)

    ci = _chunks(input_audio, n_fft, hop, n_frames, k, cp)     # (B, cp, hop) bf16
    ct = _chunks(target_audio, n_fft, hop, n_frames, k, cp)
    tail = jnp.zeros((b, 16, hop), jnp.bfloat16)               # room for the shift-by-(k-1) slice
    chunks = jnp.concatenate([ci, ct, tail], axis=1)           # (B, 2*cp+16, hop)
    rext = 2 * cp + 16

    basis = _windowed_rdft_basis(n_fft)
    freq = n_fft // 2

    kernel = functools.partial(_lsd_kernel, n_frames=n_frames, cp=cp, hop=hop,
                               k=k, freq=freq)
    per_frame = pl.pallas_call(
        kernel,
        out_shape=jax.ShapeDtypeStruct((b, 1, cp), jnp.float32),
        grid_spec=pltpu.PrefetchScalarGridSpec(
            num_scalar_prefetch=0,
            grid=(b,),
            in_specs=[
                pl.BlockSpec((1, rext, hop), lambda i: (i, 0, 0)),   # chunk rows (bf16)
                pl.BlockSpec((n_fft, n_fft), lambda i: (0, 0)),      # resident basis (bf16)
            ],
            out_specs=pl.BlockSpec((1, 1, cp), lambda i: (i, 0, 0)),
        ),
        compiler_params=pltpu.CompilerParams(dimension_semantics=("parallel",)),
    )(chunks, basis)

    scale = 10.0 / jnp.log(10.0)               # hoisted dB factor: 10*log10(r) = scale*ln(r)
    per_batch = scale * jnp.sqrt(jnp.sum(per_frame[:, 0, :], axis=-1)) / n_frames
    return jnp.mean(per_batch)


def _reference(input_audio, target_audio, *, n_fft=256, hop_length=128):
    """Plain-JAX reference (rfft) mirroring torchaudio Spectrogram(power=2)."""
    def spec(a):
        pad = n_fft // 2
        x = jnp.pad(a.astype(jnp.float32), ((0, 0), (pad, pad)), mode="reflect")
        n_frames = 1 + (x.shape[-1] - n_fft) // hop_length
        idx = jnp.arange(n_frames)[:, None] * hop_length + jnp.arange(n_fft)[None, :]
        frames = x[:, idx]
        n = jnp.arange(n_fft, dtype=jnp.float32)
        w = 0.5 - 0.5 * jnp.cos(2.0 * jnp.pi * n / n_fft)
        z = jnp.fft.rfft(frames * w, axis=-1)
        return z.real ** 2 + z.imag ** 2                        # (B, frames, n_freq)
    s_in, s_tg = spec(input_audio), spec(target_audio)
    lsd = 10.0 * (jnp.log10(s_in + 1e-5) - jnp.log10(s_tg + 1e-5))
    n_frames = s_tg.shape[1]
    lsd = jnp.sqrt(jnp.sum(lsd ** 2, axis=(-2, -1))) / n_frames
    return jnp.mean(lsd)


if __name__ == "__main__":
    key = jax.random.PRNGKey(0)
    k1, k2 = jax.random.split(key)
    B, L = 4, 8192                      # small audio; n_fft=256 / hop=128 -> 65 frames/batch
    n_fft, hop = 256, 128
    input_batch = {"audio": jax.random.normal(k1, (B, L), dtype=jnp.float32)}
    target_batch = {"audio": jax.random.normal(k2, (B, L), dtype=jnp.float32)}

    out = log_spec_distortion(input_batch["audio"], target_batch["audio"],
                              n_fft=n_fft, hop_length=hop)
    out = jax.block_until_ready(out)

    ref = _reference(input_batch["audio"], target_batch["audio"],
                     n_fft=n_fft, hop_length=hop)
    assert jnp.allclose(out, ref, rtol=5e-2, atol=5e-2), (out, ref)
    print("KERNEL_OK")
</pallas_src>

<mosaic_0001>
module attributes {stable_mosaic.version = 11 : i64} {
  func.func @_lsd_kernel(%arg0: i32, %arg1: memref<1x176x128xbf16, #tpu.memory_space<vmem>>, %arg2: memref<256x256xbf16, #tpu.memory_space<vmem>>, %arg3: memref<1x1x80xf32, #tpu.memory_space<vmem>>) attributes {dimension_semantics = [#tpu.dimension_semantics<parallel>], iteration_bounds = array<i64: 4>, scalar_prefetch = 0 : i64, scratch_operands = 0 : i64, tpu.core_type = #tpu.core_type<tc>, window_params = [{transform_indices = @transform_0, window_bounds = array<i64: 1, 176, 128>}, {pipeline_mode = #tpu.pipeline_mode<synchronous>, transform_indices = @transform_1, window_bounds = array<i64: 256, 256>}, {transform_indices = @transform_2, window_bounds = array<i64: 1, 1, 80>}]} {
    %c0 = arith.constant 0 : index
    %c0_0 = arith.constant 0 : index
    %c0_1 = arith.constant 0 : index
    %0 = vector.load %arg1[%c0, %c0_0, %c0_1] : memref<1x176x128xbf16, #tpu.memory_space<vmem>>, vector<1x176x128xbf16>
    %1 = vector.shape_cast %0 : vector<1x176x128xbf16> to vector<176x128xbf16>
    %c0_2 = arith.constant 0 : index
    %c0_3 = arith.constant 0 : index
    %2 = vector.load %arg2[%c0_2, %c0_3] : memref<256x256xbf16, #tpu.memory_space<vmem>>, vector<128x256xbf16>
    %cst = arith.constant dense<0.000000e+00> : vector<176x256xf32>
    %3 = tpu.matmul %1, %2, %cst {dimension_numbers = #tpu.dot_dimension_numbers<[1], [0], [0], [1], [0, 0, 1, 1], [], []>} : vector<176x128xbf16>, vector<128x256xbf16>, vector<176x256xf32> -> vector<176x256xf32>
    %4 = vector.extract_strided_slice %3 {offsets = [0, 0], sizes = [160, 256], strides = [1, 1]} : vector<176x256xf32> to vector<160x256xf32>
    %c128 = arith.constant 128 : index
    %c0_4 = arith.constant 0 : index
    %5 = vector.load %arg2[%c128, %c0_4] : memref<256x256xbf16, #tpu.memory_space<vmem>>, vector<128x256xbf16>
    %cst_5 = arith.constant dense<0.000000e+00> : vector<176x256xf32>
    %6 = tpu.matmul %1, %5, %cst_5 {dimension_numbers = #tpu.dot_dimension_numbers<[1], [0], [0], [1], [0, 0, 1, 1], [], []>} : vector<176x128xbf16>, vector<128x256xbf16>, vector<176x256xf32> -> vector<176x256xf32>
    %7 = vector.extract_strided_slice %6 {offsets = [1, 0], sizes = [160, 256], strides = [1, 1]} : vector<176x256xf32> to vector<160x256xf32>
    %8 = arith.addf %4, %7 : vector<160x256xf32>
    %9 = tpu.iota {dimensions = array<i32: 1>} : vector<80x128xi32>
    %c0_i32 = arith.constant 0 : i32
    %10 = vector.broadcast %c0_i32 : i32 to vector<80x128xi32>
    %11 = arith.cmpi eq, %9, %10 : vector<80x128xi32>
    %12 = vector.extract_strided_slice %8 {offsets = [0, 0], sizes = [80, 256], strides = [1, 1]} : vector<160x256xf32> to vector<80x256xf32>
    %13 = vector.extract_strided_slice %12 {offsets = [0, 0], sizes = [80, 128], strides = [1, 1]} : vector<80x256xf32> to vector<80x128xf32>
    %14 = vector.extract_strided_slice %12 {offsets = [0, 128], sizes = [80, 128], strides = [1, 1]} : vector<80x256xf32> to vector<80x128xf32>
    %15 = arith.mulf %14, %14 : vector<80x128xf32>
    %16 = arith.mulf %13, %13 : vector<80x128xf32>
    %cst_6 = arith.constant 0.000000e+00 : f32
    %17 = vector.broadcast %cst_6 : f32 to vector<80x128xf32>
    %18 = arith.select %11, %17, %15 : vector<80x128xi1>, vector<80x128xf32>
    %19 = arith.addf %16, %18 : vector<80x128xf32>
    %cst_7 = arith.constant 0.000000e+00 : f32
    %20 = vector.broadcast %cst_7 : f32 to vector<80x128xf32>
    %21 = arith.select %11, %15, %20 : vector<80x128xi1>, vector<80x128xf32>
    %cst_8 = arith.constant dense<0.000000e+00> : vector<80xf32>
    %22 = vector.multi_reduction <add>, %21, %cst_8 [1] : vector<80x128xf32> to vector<80xf32>
    %23 = vector.shape_cast %22 : vector<80xf32> to vector<1x80xf32>
    %24 = vector.extract_strided_slice %8 {offsets = [80, 0], sizes = [80, 256], strides = [1, 1]} : vector<160x256xf32> to vector<80x256xf32>
    %25 = vector.extract_strided_slice %24 {offsets = [0, 0], sizes = [80, 128], strides = [1, 1]} : vector<80x256xf32> to vector<80x128xf32>
    %26 = vector.extract_strided_slice %24 {offsets = [0, 128], sizes = [80, 128], strides = [1, 1]} : vector<80x256xf32> to vector<80x128xf32>
    %27 = arith.mulf %26, %26 : vector<80x128xf32>
    %28 = arith.mulf %25, %25 : vector<80x128xf32>
    %cst_9 = arith.constant 0.000000e+00 : f32
    %29 = vector.broadcast %cst_9 : f32 to vector<80x128xf32>
    %30 = arith.select %11, %29, %27 : vector<80x128xi1>, vector<80x128xf32>
    %31 = arith.addf %28, %30 : vector<80x128xf32>
    %cst_10 = arith.constant 0.000000e+00 : f32
    %32 = vector.broadcast %cst_10 : f32 to vector<80x128xf32>
    %33 = arith.select %11, %27, %32 : vector<80x128xi1>, vector<80x128xf32>
    %cst_11 = arith.constant dense<0.000000e+00> : vector<80xf32>
    %34 = vector.multi_reduction <add>, %33, %cst_11 [1] : vector<80x128xf32> to vector<80xf32>
    %35 = vector.shape_cast %34 : vector<80xf32> to vector<1x80xf32>
    %cst_12 = arith.constant 9.99999974E-6 : f32
    %36 = vector.broadcast %cst_12 : f32 to vector<80x128xf32>
    %37 = arith.addf %19, %36 : vector<80x128xf32>
    %38 = math.log %37 : vector<80x128xf32>
    %cst_13 = arith.constant 9.99999974E-6 : f32
    %39 = vector.broadcast %cst_13 : f32 to vector<80x128xf32>
    %40 = arith.addf %31, %39 : vector<80x128xf32>
    %41 = math.log %40 : vector<80x128xf32>
    %42 = arith.subf %38, %41 : vector<80x128xf32>
    %cst_14 = arith.constant 9.99999974E-6 : f32
    %43 = vector.broadcast %cst_14 : f32 to vector<1x80xf32>
    %44 = arith.addf %23, %43 : vector<1x80xf32>
    %45 = math.log %44 : vector<1x80xf32>
    %cst_15 = arith.constant 9.99999974E-6 : f32
    %46 = vector.broadcast %cst_15 : f32 to vector<1x80xf32>
    %47 = arith.addf %35, %46 : vector<1x80xf32>
    %48 = math.log %47 : vector<1x80xf32>
    %49 = arith.subf %45, %48 : vector<1x80xf32>
    %50 = arith.mulf %42, %42 : vector<80x128xf32>
    %cst_16 = arith.constant dense<0.000000e+00> : vector<80xf32>
    %51 = vector.multi_reduction <add>, %50, %cst_16 [1] : vector<80x128xf32> to vector<80xf32>
    %52 = vector.shape_cast %51 : vector<80xf32> to vector<1x80xf32>
    %53 = arith.mulf %49, %49 : vector<1x80xf32>
    %54 = arith.addf %52, %53 : vector<1x80xf32>
    %55 = tpu.iota {dimensions = array<i32: 1>} : vector<1x80xi32>
    %c65_i32 = arith.constant 65 : i32
    %56 = vector.broadcast %c65_i32 : i32 to vector<1x80xi32>
    %57 = arith.cmpi slt, %55, %56 : vector<1x80xi32>
    %cst_17 = arith.constant 0.000000e+00 : f32
    %58 = vector.broadcast %cst_17 : f32 to vector<1x80xf32>
    %59 = arith.select %57, %54, %58 : vector<1x80xi1>, vector<1x80xf32>
    %60 = vector.shape_cast %59 : vector<1x80xf32> to vector<1x1x80xf32>
    %c0_18 = arith.constant 0 : index
    %c0_19 = arith.constant 0 : index
    %c0_20 = arith.constant 0 : index
    %61 = vector.load %arg3[%c0_18, %c0_19, %c0_20] : memref<1x1x80xf32, #tpu.memory_space<vmem>>, vector<1x1x80xf32>
    tpu.vector_store %arg3[%c0_18, %c0_19, %c0_20], %60 {strides = array<i32>} : memref<1x1x80xf32, #tpu.memory_space<vmem>>, vector<1x1x80xf32>,
    return
  }
  func.func @transform_0(%arg0: i32) -> (i32, i32, i32) {
    %c0_i32 = arith.constant 0 : i32
    %c0_i32_0 = arith.constant 0 : i32
    %c0_i32_1 = arith.constant 0 : i32
    return %arg0, %c0_i32, %c0_i32_0 : i32, i32, i32
  }
  func.func @transform_1(%arg0: i32) -> (i32, i32) {
    %c0_i32 = arith.constant 0 : i32
    %c0_i32_0 = arith.constant 0 : i32
    %c0_i32_1 = arith.constant 0 : i32
    return %c0_i32, %c0_i32_0 : i32, i32
  }
  func.func @transform_2(%arg0: i32) -> (i32, i32, i32) {
    %c0_i32 = arith.constant 0 : i32
    %c0_i32_0 = arith.constant 0 : i32
    %c0_i32_1 = arith.constant 0 : i32
    return %arg0, %c0_i32, %c0_i32_0 : i32, i32, i32
  }
}

</mosaic_0001>

<bundles_post_ra>
// kernel: tpu_custom_call.1
= control target key start
LH: loop header
LB: loop body
LE: loop exit
PB: predicated region body
PF: predicated region fallthrough
CT: control target
= control target key end

     0   :  { %7 = vsyncpa [#allocation3], 0  ;;  %s2327_s0 = inlined_call_operand.hbm [shape: bf16[4,176,128], index: 0, kind: input, shape index: {}]   ;;  %s2328_s1 = inlined_call_operand.hbm [shape: bf16[256,256], index: 1, kind: input, shape index: {}]   ;;  %s2329_s2 = inlined_call_operand.hbm [shape: f32[4,1,80], index: 2, kind: output, shape index: {}]  }
   0x1   :  { %9 = vsyncpa [#allocation3 + $0x1], 0 }
   0x2   :  { %10 = vsyncpa [#allocation6], 0 }
   0x3   :  { %11 = vsyncpa [#allocation4], 0 }
   0x4   :  { %13 = vsyncpa [#allocation4 + $0x1], 0  ;;  %s1850_s9 = smov 0   ;;  %s1852_s10 = smov 0  }
   0x5   :  { %s1854_s11 = smov 0   ;;  %s1856_s12 = smov 0  }
   0x6 LB: > { %s1871_s13 = sadd.s32 4294967295, %s1825_s12   ;;  %s1446_s14 = sadd.s32 4294967294, %s1825_s12   ;;  %s1825_s12 = sphi %s1856_s12, %s2350_s12   ;;  %s1821_s11 = sphi %s1854_s11, %s2349_s11   ;;  %s1817_s10 = sphi %s1852_s10, %s2348_s10   ;;  %s1813_s9 = sphi %s1850_s9, %s2347_s9  }
   0x7   : > { %p39_p0 = scmp.ne.s32.totalorder %s1817_s10, %s1813_s9  ;;  %p2330_p1 = scmp.eq.s32.totalorder %s1871_s13, 0 }
   0x8   : > { %p90_p3 = scmp.eq.s32.totalorder %s1446_s14, 3  ;;  %p1447_p5 = scmp.ge.s32.totalorder %s1825_s12, 1 }
   0x9   : > { %p1880_p4 = por %p2330_p1, %p39_p0  ;;  %p97_p7 = scmp.lt.s32.totalorder %s1825_s12, 5 }
   0xa   : > { %p1885_p6 = por %p90_p3, %p39_p0  ;;  %s1827_s18 = smov [#allocation5]  }
   0xb   : > { %s2334_s15 = scalar_select %p1880_p4, 1, 0 }
   0xc   : > { %s2335_s16 = scalar_select %p1885_p6, 1, 0 }
   0xd   : > { %p1890_p8 = pnand %p1447_p5, %p97_p7  ;;  %s109_s19 = sshll.u32 %s1827_s18, 4  ;;  %s110_s19 = int_to_ptr.vmem [resolvable:$true] %s109_s19 }
   0xe   : > { %s1903_s21 = sadd.s32 1, %s1825_s12   ;;  %s26_s22 = sadd.s32 1, %s1821_s11 }
   0xf   : > { %s2336_s17 = scalar_select %p1890_p8, 1, 0 }
  0x10   : > { %p1510_p9 = pneg %p1890_p8  ;;  %s23_s23 = ssub.s32 %s1825_s12, %s1903_s21 }
  0x11   : > { %s1714_s24 = scalar_lea.vmem %s110_s19, 4096  ;;  %p1722_p3 = scmp.lt.s32.totalorder %s110_s19, %s110_s19 }
  0x12   : > { %p1898_p10 = pnand %p1510_p9, %p2330_p1  ;;  %p1715_p12 = scmp.ne.s32.totalorder %s110_s19, %s1714_s24 }
  0x13   : > { %p1723_p5 = scmp.lt.s32.totalorder %s1714_s24, %s1714_s24 }
  0x14   : > { %p1705_p11 = pneg %p1898_p10 }
  0x15   : > { %p1724_p7 = por %p1723_p5, %p1722_p3 }
  0x16   : > { %p1717_p13 = pnand %p1715_p12, %p1705_p11 }
  0x18   : > { %p1718_p0 = pneg %p1717_p13 }
  0x1a   : > { %p1725_p2 = pnand %p1724_p7, %p1718_p0 }
  0x1c   : > { %1728 = shalt.err (!%p1725_p2)
}
  0x1d   : > { %s1828_s25 = smov 128   ;;  %s1829_s26 = smov 8  }
  0x1e   : > { %1513 = dma.hbm_to_vmem [thread:$0]  (!%p1898_p10), %s2328_s1, 4096, %s110_s19, [#allocation6], %s1828_s25, %s1828_s25, %s1829_s26  }
  0x1f   : > { %p24_p9 = scmp.eq.s32.totalorder %s23_s23, 0  ;;  %p33_p11 = scmp.ne.s32.totalorder %s1821_s11, %s1817_s10 }
  0x20   : > { %p34_p12 = scmp.eq.s32.totalorder %s1825_s12, 0  ;;  %p1523_p2 = scmp.lt.s32.totalorder %s1825_s12, 4 }
  0x21   : > { %s1920_s29 = scalar_select %p24_p9, %s1821_s11, %s26_s22  }
  0x22   : > { %p35_p13 = por %p34_p12, %p33_p11  ;;  %p2338_p0 = scmp.eq.s32.totalorder %s1871_s13, 3 }
  0x23   : > { %s123_s3 = sand.u32 1, %s1821_s11   ;;  %s1500_s4 = smul.u32 1408, %s1825_s12 }
  0x24   : > { %p1924_p3 = por %p2338_p0, %p33_p11  ;;  %s1499_s5 = smul.u32 88, %s123_s3 }
  0x25   : > { %s1933_s8 = scalar_lea.hbm %s2327_s0, %s1500_s4  ;;  %p1935_p10 = pnand %p1523_p2, %p35_p13 }
  0x26   : > { %s2339_s30 = scalar_select %p1924_p3, 1, 0 }
  0x27   : > { %s127_s18 = scalar_lea.vmem [#allocation2], %s1499_s5  ;;  %s1941_s20 = scalar_lea.sflag [#allocation3], %s123_s3 }
  0x28   : > { %s134_s19 = sshll.u32 %s127_s18, 4  ;;  %s1729_s22 = scalar_lea.hbm %s1933_s8, 1408  ;;  %s1939_s19 = int_to_ptr.vmem [resolvable:$true] %s134_s19 }
  0x29   : > { %p1730_p5 = scmp.ne.s32.totalorder %s1933_s8, %s1729_s22  ;;  %p1731_p7 = pneg %p1935_p10 }
  0x2a   : > { %s1734_s25 = scalar_lea.hbm %s2327_s0, 5632  ;;  %p1735_p12 = scmp.lt.s32.totalorder %s1933_s8, %s2327_s0 }
  0x2b   : > { %p1732_p9 = pnand %p1731_p7, %p1730_p5  ;;  %p1736_p2 = scmp.lt.s32.totalorder %s1734_s25, %s1729_s22 }
  0x2d   : > { %p1733_p11 = pneg %p1732_p9  ;;  %p1737_p13 = por %p1736_p2, %p1735_p12 }
  0x2f   : > { %p1738_p0 = pnand %p1737_p13, %p1733_p11 }
  0x31   : > { %1741 = shalt.err (!%p1738_p0)
}
  0x32   : > { %s1742_s28 = scalar_lea.vmem %s1939_s19, 1408  ;;  %s1830_s3 = smov [#allocation2]  }
  0x33   : > { %p1743_p1 = scmp.ne.s32.totalorder %s1939_s19, %s1742_s28  ;;  %s1747_s4 = sshll.u32 %s1830_s3, 4  ;;  %s1748_s4 = int_to_ptr.vmem [resolvable:$false] %s1747_s4 }
  0x34   : > { %s1749_s5 = scalar_lea.vmem %s1748_s4, 2816  ;;  %p1750_p9 = scmp.lt.s32.totalorder %s1939_s19, %s1748_s4 }
  0x35   : > { %p1745_p6 = pnand %p1743_p1, %p1731_p7  ;;  %p1751_p3 = scmp.lt.s32.totalorder %s1749_s5, %s1742_s28 }
  0x37   : > { %p1746_p5 = pneg %p1745_p6  ;;  %p1752_p4 = por %p1751_p3, %p1750_p9 }
  0x39   : > { %p1753_p8 = pnand %p1752_p4, %p1746_p5 }
  0x3b   : > { %1756 = shalt.err (!%p1753_p8)
}
  0x3c   : > { %s1831_s6 = smov 64   ;;  %s1832_s7 = smov 4  }
  0x3d   : > { %1517 = dma.hbm_to_vmem [thread:$0]  (!%p1935_p10), %s1933_s8, 1408, %s1939_s19, %s1941_s20, %s1831_s6, %s1831_s6, %s1832_s7  }
  0x3e   : > { %p2341_p1 = scmp.ne.s32.totalorder %s2336_s17, 0 }
  0x3f   : > { %s1965_s18 = sand.u32 (!%p2341_p1), 1, %s1817_s10   ;;  %p2342_p4 = scmp.ne.s32.totalorder (!%p2341_p1), %s2334_s15, 0 }
  0x40   : > { %146 = sbr.rel (%p2341_p1) target bundleno = 571 (0x23b), region = 28  ;;  %s149_s23 = scalar_lea.sflag (!%p2341_p1), [#allocation3], %s1965_s18 }
  0x41   : > { %s1501_s22 = smul.u32 (!%p2341_p1), 88, %s1965_s18 }
  0x43   : > { %s1969_s24 = scalar_lea.vmem (!%p2341_p1), [#allocation2], %s1501_s22 }
  0x45   : > { %1800 = dma.done.wait (%p2342_p4), %s149_s23, 1408  }
  0x46   : > { %1802 = vsyncadd (%p2342_p4), %s149_s23, 4294965888  ;;  %p2343_p6 = scmp.eq.s32.totalorder %s1871_s13, 0 }
  0x48   : > { %1804 = dma.done.wait (%p2343_p6), [#allocation6], 4096   ;;  %p2344_p8 = pmov %p2343_p6 }
  0x49   : > { %v1833_v0 = vmov 0   ;;  %v1564_v1 = vld [vmem:[#allocation5 + $0xf4] ss:$8 sps:$4 sm:$0xff]   ;;  %v1568_v3 = vld [vmem:[#allocation5 + $0xf0] ss:$8 sps:$4 sm:$0xff]   ;;  %v1615_v36 = vld [vmem:[%s1969_s24 + $0x18] sm:$0xff]   ;;  %v942_v48 = vlaneseq }
  0x4a   : > { %1806 = vsyncadd (%p2344_p8), [#allocation6], 4294963200  ;;  %628 = vmatprep.mubr.bf16.mxu1 %v1833_v0  ;;  %393 = vmatprep.mubr.bf16.mxu0 %v1833_v0  ;;  %v1566_v2 = vld [vmem:[#allocation5 + $0x74] ss:$8 sps:$4 sm:$0xff]   ;;  %v1569_v4 = vld [vmem:[#allocation5 + $0x70] ss:$8 sps:$4 sm:$0xff]  }
  0x4b   : > { %596 = vmatprep.subr.bf16.mxu1 %v1564_v1  ;;  %361 = vmatprep.subr.bf16.mxu0 %v1566_v2  ;;  %v1570_v5 = vld [vmem:[#allocation5 + $0xe4] ss:$8 sps:$4 sm:$0xff]   ;;  %v1574_v7 = vld [vmem:[#allocation5 + $0xe0] ss:$8 sps:$4 sm:$0xff]   ;;  %v1576_v9 = vld [vmem:[#allocation5 + $0xd4] ss:$8 sps:$4 sm:$0xff]  }
  0x4c   : > { %597 = vmatpush1.bf16.msra.mxu1 %v1568_v3  ;;  %362 = vmatpush1.bf16.msra.mxu0 %v1569_v4  ;;  %v1572_v6 = vld [vmem:[#allocation5 + $0x64] ss:$8 sps:$4 sm:$0xff]   ;;  %v1575_v8 = vld [vmem:[#allocation5 + $0x60] ss:$8 sps:$4 sm:$0xff]   ;;  %v1578_v10 = vld [vmem:[#allocation5 + $0x54] ss:$8 sps:$4 sm:$0xff]  }
  0x4d   : > { %598 = vmatprep.subr.bf16.mxu1 %v1570_v5  ;;  %363 = vmatprep.subr.bf16.mxu0 %v1572_v6  ;;  %v1580_v11 = vld [vmem:[#allocation5 + $0xd0] ss:$8 sps:$4 sm:$0xff]   ;;  %v1582_v13 = vld [vmem:[#allocation5 + $0xc4] ss:$8 sps:$4 sm:$0xff]   ;;  %v1586_v15 = vld [vmem:[#allocation5 + $0xc0] ss:$8 sps:$4 sm:$0xff]  }
  0x4e   : > { %v1581_v12 = vld [vmem:[#allocation5 + $0x50] ss:$8 sps:$4 sm:$0xff]   ;;  %v1584_v14 = vld [vmem:[#allocation5 + $0x44] ss:$8 sps:$4 sm:$0xff]   ;;  %v1587_v16 = vld [vmem:[#allocation5 + $0x40] ss:$8 sps:$4 sm:$0xff]  }
  0x4f   : > { %v1588_v17 = vld [vmem:[#allocation5 + $0xb4] ss:$8 sps:$4 sm:$0xff]   ;;  %v1592_v19 = vld [vmem:[#allocation5 + $0xb0] ss:$8 sps:$4 sm:$0xff]   ;;  %v1594_v21 = vld [vmem:[#allocation5 + $0xa4] ss:$8 sps:$4 sm:$0xff]  }
  0x50   : > { %599 = vmatpush1.bf16.msra.mxu1 %v1574_v7  ;;  %364 = vmatpush1.bf16.msra.mxu0 %v1575_v8  ;;  %v1590_v18 = vld [vmem:[#allocation5 + $0x34] ss:$8 sps:$4 sm:$0xff]   ;;  %v1593_v20 = vld [vmem:[#allocation5 + $0x30] ss:$8 sps:$4 sm:$0xff]   ;;  %v1596_v22 = vld [vmem:[#allocation5 + $0x24] ss:$8 sps:$4 sm:$0xff]  }
  0x51   : > { %600 = vmatprep.subr.bf16.mxu1 %v1576_v9  ;;  %365 = vmatprep.subr.bf16.mxu0 %v1578_v10  ;;  %v1598_v23 = vld [vmem:[#allocation5 + $0xa0] ss:$8 sps:$4 sm:$0xff]   ;;  %v1600_v25 = vld [vmem:[#allocation5 + $0x94] ss:$8 sps:$4 sm:$0xff]   ;;  %v1604_v27 = vld [vmem:[#allocation5 + $0x90] ss:$8 sps:$4 sm:$0xff]  }
  0x52   : > { %v1599_v24 = vld [vmem:[#allocation5 + $0x20] ss:$8 sps:$4 sm:$0xff]   ;;  %v1602_v26 = vld [vmem:[#allocation5 + $0x14] ss:$8 sps:$4 sm:$0xff]   ;;  %v1605_v28 = vld [vmem:[#allocation5 + $0x10] ss:$8 sps:$4 sm:$0xff]  }
  0x53   : > { %v1606_v29 = vld [vmem:[#allocation5 + $0x84] ss:$8 sps:$4 sm:$0xff]   ;;  %v1610_v31 = vld [vmem:[#allocation5 + $0x80] ss:$8 sps:$4 sm:$0xff]   ;;  %v1613_v34 = vld [vmem:[%s1969_s24 + $0x8] sm:$0xff]   ;;  %v2017_v55 = vand.u32 127, %v942_v48 }
  0x54   : > { %601 = vmatpush1.bf16.msra.mxu1 %v1580_v11  ;;  %366 = vmatpush1.bf16.msra.mxu0 %v1581_v12  ;;  %v1608_v30 = vld [vmem:[#allocation5 + $0x4] ss:$8 sps:$4 sm:$0xff]   ;;  %v1611_v32 = vld [vmem:[#allocation5] ss:$8 sps:$4 sm:$0xff]   ;;  %v1617_v38 = vld [vmem:[%s1969_s24 + $0x28] sm:$0xff]   ;;  %vm779_vm0 = vcmask 1046528  }
  0x55   : > { %602 = vmatprep.subr.bf16.mxu1 %v1582_v13  ;;  %367 = vmatprep.subr.bf16.mxu0 %v1584_v14  ;;  %v1612_v33 = vld [vmem:[%s1969_s24] sm:$0xff]   ;;  %v1614_v35 = vld [vmem:[%s1969_s24 + $0x10] sm:$0xff]   ;;  %v1619_v40 = vld [vmem:[%s1969_s24 + $0x38] sm:$0xff]   ;;  %vm944_vm1 = vcmp.eq.s32.totalorder %v2017_v55, 0  ;;  %vm1295_vm2 = vcmask 130112   ;;  %vm1302_vm3 = vcmask 195712  }
  0x56   : > { %v1616_v37 = vld [vmem:[%s1969_s24 + $0x20] sm:$0xff]   ;;  %v1618_v39 = vld [vmem:[%s1969_s24 + $0x30] sm:$0xff]   ;;  %v1621_v42 = vld [vmem:[%s1969_s24 + $0x48] sm:$0xff]   ;;  %vm1309_vm4 = vcmask 261312   ;;  %vm1316_vm5 = vcmask 326912   ;;  %vm1323_vm6 = vcmask 392512  }
  0x57   : > { %v1620_v41 = vld [vmem:[%s1969_s24 + $0x40] sm:$0xff]   ;;  %v1622_v43 = vld [vmem:[%s1969_s24 + $0x50] sm:$0xff]   ;;  %vm1330_vm7 = vcmask 458112   ;;  %vm1337_vm8 = vcmask 523712   ;;  %vm1344_vm9 = vcmask 589312   ;;  %vm1351_vm10 = vcmask 654912  }
  0x58   : > { %603 = vmatpush1.bf16.msra.mxu1 %v1586_v15  ;;  %368 = vmatpush1.bf16.msra.mxu0 %v1587_v16  ;;  %s1496_s15 = sshll.u32 %s1871_s13, 4  ;;  %s175_s17 = scalar_lea.vmem [#allocation7], %s1965_s18  ;;  %vm1275_vm11 = vcmp.lt.s32.totalorder %v2017_v55, 65  ;;  %vm1355_vm12 = vcmask 647168  }
  0x59   : > { %604 = vmatprep.subr.bf16.mxu1 %v1588_v17  ;;  %369 = vmatprep.subr.bf16.mxu0 %v1590_v18  ;;  %s1370_s8 = sshll.u32 %s175_s17, 4  ;;  %s2291_s20 = scalar_lea.hbm %s2329_s2, %s1496_s15  ;;  %s1371_s8 = int_to_ptr.vmem [resolvable:$true] %s1370_s8 }
  0x5a   : > { %s1358_s25 = scalar_lea.sflag [#allocation4], %s1965_s18  ;;  %s1757_s13 = scalar_lea.vmem %s1371_s8, 16 }
  0x5b   : > { %p1758_p3 = scmp.ne.s32.totalorder %s1371_s8, %s1757_s13  ;;  %p2345_p10 = scmp.ne.s32.totalorder %s2339_s30, 0 }
  0x5c   : > { %605 = vmatpush1.bf16.msra.mxu1 %v1592_v19  ;;  %370 = vmatpush1.bf16.msra.mxu0 %v1593_v20  ;;  %s1834_s26 = smov [#allocation7]  }
  0x5d   : > { %606 = vmatprep.subr.bf16.mxu1 %v1594_v21  ;;  %371 = vmatprep.subr.bf16.mxu0 %v1596_v22  ;;  %p1759_p7 = pnand %p1758_p3, %p2345_p10  ;;  %s1761_s27 = sshll.u32 %s1834_s26, 4  ;;  %s1762_s27 = int_to_ptr.vmem [resolvable:$false] %s1761_s27 }
  0x5e   : > { %s1763_s28 = scalar_lea.vmem %s1762_s27, 32  ;;  %p1764_p12 = scmp.lt.s32.totalorder %s1371_s8, %s1762_s27 }
  0x5f   : > { %p1760_p11 = pneg %p1759_p7  ;;  %p1765_p2 = scmp.lt.s32.totalorder %s1763_s28, %s1757_s13 }
  0x60   : > { %607 = vmatpush1.bf16.msra.mxu1 %v1598_v23  ;;  %372 = vmatpush1.bf16.msra.mxu0 %v1599_v24 }
  0x61   : > { %608 = vmatprep.subr.bf16.mxu1 %v1600_v25  ;;  %373 = vmatprep.subr.bf16.mxu0 %v1602_v26  ;;  %p1766_p13 = por %p1765_p2, %p1764_p12 }
  0x63   : > { %p1767_p0 = pnand %p1766_p13, %p1760_p11 }
  0x64   : > { %609 = vmatpush1.bf16.msra.mxu1 %v1604_v27  ;;  %374 = vmatpush1.bf16.msra.mxu0 %v1605_v28 }
  0x65   : > { %610 = vmatprep.subr.bf16.mxu1 %v1606_v29  ;;  %375 = vmatprep.subr.bf16.mxu0 %v1608_v30 }
  0x68   : > { %611 = vmatpush1.bf16.msra.mxu1 %v1610_v31  ;;  %376 = vmatpush1.bf16.msra.mxu0 %v1611_v32 }
  0x6b   : > { %629 = vmatmul.mubr.bf16.vlgmr.msra.gmra.mxu1 %v1612_v33  ;;  %394 = vmatmul.mubr.bf16.vlgmr.msra.gmra.mxu0 %v1612_v33 }
  0x6c   : > { %638 = vmatprep.mubr.bf16.mxu1 %v1833_v0  ;;  %403 = vmatprep.mubr.bf16.mxu0 %v1833_v0 }
  0x73   : > { %639 = vmatmul.mubr.bf16.gmra.mxu1 %v1613_v34  ;;  %404 = vmatmul.mubr.bf16.gmra.mxu0 %v1613_v34 }
  0x74   : > { %648 = vmatprep.mubr.bf16.mxu1 %v1833_v0  ;;  %413 = vmatprep.mubr.bf16.mxu0 %v1833_v0 }
  0x7b   : > { %649 = vmatmul.mubr.bf16.gmra.mxu1 %v1614_v35  ;;  %414 = vmatmul.mubr.bf16.gmra.mxu0 %v1614_v35 }
  0x7c   : > { %658 = vmatprep.mubr.bf16.mxu1 %v1833_v0  ;;  %423 = vmatprep.mubr.bf16.mxu0 %v1833_v0 }
  0x83   : > { %659 = vmatmul.mubr.bf16.gmra.mxu1 %v1615_v36  ;;  %424 = vmatmul.mubr.bf16.gmra.mxu0 %v1615_v36 }
  0x84   : > { %668 = vmatprep.mubr.bf16.mxu1 %v1833_v0  ;;  %433 = vmatprep.mubr.bf16.mxu0 %v1833_v0 }
  0x8b   : > { %669 = vmatmul.mubr.bf16.gmra.mxu1 %v1616_v37  ;;  %434 = vmatmul.mubr.bf16.gmra.mxu0 %v1616_v37 }
  0x8c   : > { %678 = vmatprep.mubr.bf16.mxu1 %v1833_v0  ;;  %443 = vmatprep.mubr.bf16.mxu0 %v1833_v0 }
  0x93   : > { %679 = vmatmul.mubr.bf16.gmra.mxu1 %v1617_v38  ;;  %444 = vmatmul.mubr.bf16.gmra.mxu0 %v1617_v38 }
  0x94   : > { %688 = vmatprep.mubr.bf16.mxu1 %v1833_v0  ;;  %453 = vmatprep.mubr.bf16.mxu0 %v1833_v0 }
  0x9b   : > { %689 = vmatmul.mubr.bf16.gmra.mxu1 %v1618_v39  ;;  %454 = vmatmul.mubr.bf16.gmra.mxu0 %v1618_v39 }
  0x9c   : > { %698 = vmatprep.mubr.bf16.mxu1 %v1833_v0  ;;  %463 = vmatprep.mubr.bf16.mxu0 %v1833_v0 }
  0xa3   : > { %699 = vmatmul.mubr.bf16.gmra.mxu1 %v1619_v40  ;;  %464 = vmatmul.mubr.bf16.gmra.mxu0 %v1619_v40 }
  0xa4   : > { %708 = vmatprep.mubr.bf16.mxu1 %v1833_v0  ;;  %473 = vmatprep.mubr.bf16.mxu0 %v1833_v0 }
  0xab   : > { %709 = vmatmul.mubr.bf16.gmra.mxu1 %v1620_v41  ;;  %474 = vmatmul.mubr.bf16.gmra.mxu0 %v1620_v41 }
  0xac   : > { %718 = vmatprep.mubr.bf16.mxu1 %v1833_v0  ;;  %483 = vmatprep.mubr.bf16.mxu0 %v1833_v0 }
  0xb3   : > { %719 = vmatmul.mubr.bf16.gmra.mxu1 %v1621_v42  ;;  %484 = vmatmul.mubr.bf16.gmra.mxu0 %v1621_v42 }
  0xb4   : > { %728 = vmatprep.mubr.bf16.mxu1 %v1833_v0  ;;  %493 = vmatprep.mubr.bf16.mxu0 %v1833_v0 }
  0xbb   : > { %729 = vmatmul.mubr.bf16.gmra.mxu1 %v1622_v43  ;;  %494 = vmatmul.mubr.bf16.gmra.mxu0 %v1622_v43 }
 0x12b   : > { %v630_v44 = vpop.f32.mrf.mxu1  ;;  %v395_v45 = vpop.f32.mrf.mxu0 }
 0x12c   : > { %v780_v8 = vrot.slane %v630_v44, 1 }
 0x12d   : > { %v632_v46 = vpop.f32.mrf.mxu1  ;;  %v397_v47 = vpop.f32.mrf.mxu0 }
 0x12e   : > { %v783_v53 = vrot.slane %v632_v46, 1 }
 0x12f   : > { %v2012_v49 = vpop.f32.mrf.mxu1  ;;  %v2014_v50 = vpop.f32.mrf.mxu0 }
 0x130   : > { %v781_v2 = vrot.slane %v2012_v49, 1 }
 0x131   : > { %v636_v51 = vpop.f32.mrf.mxu1  ;;  %v401_v52 = vpop.f32.mrf.mxu0 }
 0x132   : > { %v784_v54 = vrot.slane %v636_v51, 1  ;;  %v782_v13 = vsel %vm779_vm0, %v780_v8, %v781_v2 }
 0x133   : > { %v2019_v56 = vpop.f32.mrf.mxu1  ;;  %v2021_v57 = vpop.f32.mrf.mxu0  ;;  %v902_v20 = vadd.f32 %v782_v13, %v395_v45 }
 0x134   : > { %v785_v58 = vsel %vm779_vm0, %v783_v53, %v784_v54  ;;  %v786_v33 = vrot.slane %v2019_v56, 1 }
 0x135   : > { %v642_v59 = vpop.f32.mrf.mxu1  ;;  %v407_v60 = vpop.f32.mrf.mxu0  ;;  %v903_v61 = vadd.f32 %v785_v58, %v397_v47  ;;  %v955_v32 = vmul.f32 %v902_v20, %v902_v20 }
 0x136   : > { %v788_v62 = vrot.slane %v642_v59, 1  ;;  %v787_v51 = vsel %vm779_vm0, %v781_v2, %v786_v33 }
 0x137   : > { %v2025_v63 = vpop.f32.mrf.mxu1  ;;  %v2027_v0 = vpop.f32.mrf.mxu0  ;;  %v945_v1 = vmul.f32 %v903_v61, %v903_v61 }
 0x138   : > { %v789_v3 = vsel %vm779_vm0, %v784_v54, %v788_v62  ;;  %v790_v25 = vrot.slane %v2025_v63, 1  ;;  %v904_v63 = vadd.f32 %v787_v51, %v2014_v50 }
 0x139   : > { %v646_v4 = vpop.f32.mrf.mxu1  ;;  %v985_v5 = vsel %vm944_vm1, %v945_v1, 0.0  ;;  %v411_v6 = vpop.f32.mrf.mxu0  ;;  %v905_v7 = vadd.f32 %v789_v3, %v401_v52  ;;  %v965_v30 = vsel %vm944_vm1, 0.0, %v945_v1 }
 0x13a   : > { %v792_v9 = vrot.slane %v646_v4, 1  ;;  %995 = vadd.xlane.f32.xlu0 %v985_v5  ;;  %v791_v38 = vsel %vm779_vm0, %v786_v33, %v790_v25  ;;  %v975_v39 = vadd.f32 %v965_v30, %v955_v32 }
 0x13b   : > { %v2033_v10 = vpop.f32.mrf.mxu1  ;;  %v2035_v11 = vpop.f32.mrf.mxu0  ;;  %v2037_v12 = vmul.f32 %v905_v7, %v905_v7  ;;  %v906_v52 = vadd.f32 %v791_v38, %v2021_v57 }
 0x13c   : > { %v793_v14 = vsel %vm779_vm0, %v788_v62, %v792_v9  ;;  %v794_v45 = vrot.slane %v2033_v10, 1  ;;  %v1085_v54 = vadd.f32 1e-05, %v975_v39 }
 0x13d   : > { %v652_v15 = vpop.f32.mrf.mxu1  ;;  %v986_v16 = vsel %vm944_vm1, %v2037_v12, 0.0  ;;  %v417_v17 = vpop.f32.mrf.mxu0  ;;  %v907_v18 = vadd.f32 %v793_v14, %v407_v60  ;;  %v957_v4 = vmul.f32 %v906_v52, %v906_v52  ;;  %v966_v14 = vsel %vm944_vm1, 0.0, %v2037_v12 }
 0x13e   : > { %v796_v19 = vrot.slane %v652_v15, 1  ;;  %997 = vadd.xlane.f32.xlu0 %v986_v16  ;;  %v795_v1 = vsel %vm779_vm0, %v790_v25, %v794_v45  ;;  %1623 = vlog2.f32 %v1085_v54 }
 0x13f   : > { %v2044_v21 = vpop.f32.mrf.mxu1  ;;  %v2046_v22 = vpop.f32.mrf.mxu0  ;;  %v947_v23 = vmul.f32 %v907_v18, %v907_v18  ;;  %v908_v13 = vadd.f32 %v795_v1, %v2027_v0 }
 0x140   : > { %v797_v24 = vsel %vm779_vm0, %v792_v9, %v796_v19  ;;  %v798_v56 = vrot.slane %v2044_v21, 1 }
 0x141   : > { %v656_v26 = vpop.f32.mrf.mxu1  ;;  %v987_v27 = vsel %vm944_vm1, %v947_v23, 0.0  ;;  %v421_v28 = vpop.f32.mrf.mxu0  ;;  %v909_v29 = vadd.f32 %v797_v24, %v411_v6  ;;  %v967_v5 = vsel %vm944_vm1, 0.0, %v947_v23 }
 0x142   : > { %v800_v31 = vrot.slane %v656_v26, 1  ;;  %999 = vadd.xlane.f32.xlu0 %v987_v27  ;;  %v799_v7 = vsel %vm779_vm0, %v794_v45, %v798_v56  ;;  %v977_v18 = vadd.f32 %v967_v5, %v957_v4 }
 0x143   : > { %v2055_v34 = vpop.f32.mrf.mxu1  ;;  %v2057_v35 = vpop.f32.mrf.mxu0  ;;  %v948_v36 = vmul.f32 %v909_v29, %v909_v29  ;;  %v910_v23 = vadd.f32 %v799_v7, %v2035_v11 }
 0x144   : > { %v801_v37 = vsel %vm779_vm0, %v796_v19, %v800_v31  ;;  %v802_v15 = vrot.slane %v2055_v34, 1  ;;  %v1087_v32 = vadd.f32 1e-05, %v977_v18 }
 0x145   : > { %v662_v40 = vpop.f32.mrf.mxu1  ;;  %v988_v41 = vsel %vm944_vm1, %v948_v36, 0.0  ;;  %v427_v42 = vpop.f32.mrf.mxu0  ;;  %v911_v43 = vadd.f32 %v801_v37, %v417_v17  ;;  %v956_v17 = vmul.f32 %v904_v63, %v904_v63  ;;  %v968_v30 = vsel %vm944_vm1, 0.0, %v948_v36 }
 0x146   : > { %v804_v44 = vrot.slane %v662_v40, 1  ;;  %1001 = vadd.xlane.f32.xlu0 %v988_v41  ;;  %v803_v29 = vsel %vm779_vm0, %v798_v56, %v802_v15  ;;  %v959_v39 = vmul.f32 %v910_v23, %v910_v23  ;;  %1625 = vlog2.f32 %v1087_v32 }
 0x147   : > { %v2064_v46 = vpop.f32.mrf.mxu1  ;;  %v2066_v47 = vpop.f32.mrf.mxu0  ;;  %v949_v49 = vmul.f32 %v911_v43, %v911_v43  ;;  %v976_v24 = vadd.f32 %v966_v14, %v956_v17  ;;  %v912_v41 = vadd.f32 %v803_v29, %v2046_v22 }
 0x148   : > { %v805_v53 = vsel %vm779_vm0, %v800_v31, %v804_v44  ;;  %v806_v11 = vrot.slane %v2064_v46, 1 }
 0x149   : > { %v666_v58 = vpop.f32.mrf.mxu1  ;;  %v989_v59 = vsel %vm944_vm1, %v949_v49, 0.0  ;;  %v431_v60 = vpop.f32.mrf.mxu0  ;;  %v913_v61 = vadd.f32 %v805_v53, %v421_v28  ;;  %v958_v28 = vmul.f32 %v908_v13, %v908_v13  ;;  %v969_v33 = vsel %vm944_vm1, 0.0, %v949_v49 }
 0x14a   : > { %v808_v62 = vrot.slane %v666_v58, 1  ;;  %1003 = vadd.xlane.f32.xlu0 %v989_v59  ;;  %v979_v46 = vadd.f32 %v969_v33, %v959_v39  ;;  %v1086_v51 = vadd.f32 1e-05, %v976_v24  ;;  %v807_v52 = vsel %vm779_vm0, %v802_v15, %v806_v11 }
 0x14b   : > { %v2076_v2 = vpop.f32.mrf.mxu1  ;;  %v2078_v57 = vpop.f32.mrf.mxu0  ;;  %v950_v3 = vmul.f32 %v913_v61, %v913_v61  ;;  %v960_v61 = vmul.f32 %v912_v41, %v912_v41  ;;  %v914_v7 = vadd.f32 %v807_v52, %v2057_v35 }
 0x14c   : > { %v809_v6 = vsel %vm779_vm0, %v804_v44, %v808_v62  ;;  %1627 = vlog2.f32 %v1086_v51 }
 0x14d   : > { %v672_v8 = vpop.f32.mrf.mxu1  ;;  %v990_v50 = vsel %vm944_vm1, %v950_v3, 0.0  ;;  %v437_v9 = vpop.f32.mrf.mxu0  ;;  %v915_v10 = vadd.f32 %v809_v6, %v427_v42  ;;  %v978_v42 = vadd.f32 %v968_v30, %v958_v28  ;;  %v970_v22 = vsel %vm944_vm1, 0.0, %v950_v3 }
 0x14e   : > { %v812_v16 = vrot.slane %v672_v8, 1  ;;  %1005 = vadd.xlane.f32.xlu0 %v990_v50  ;;  %v1624_v6 = vpop.eup %1623  ;;  %v1089_v8 = vadd.f32 1e-05, %v979_v46 }
 0x14f   : > { %v2091_v19 = vpop.f32.mrf.mxu1  ;;  %v2093_v20 = vpop.f32.mrf.mxu0  ;;  %v2095_v21 = vmul.f32 %v915_v10, %v915_v10  ;;  %v980_v10 = vadd.f32 %v970_v22, %v960_v61 }
 0x150   : > { %v813_v0 = vsel %vm779_vm0, %v808_v62, %v812_v16  ;;  %v1088_v62 = vadd.f32 1e-05, %v978_v42 }
 0x151   : > { %v676_v25 = vpop.f32.mrf.mxu1  ;;  %v991_v12 = vsel %vm944_vm1, %v2095_v21, 0.0  ;;  %v441_v26 = vpop.f32.mrf.mxu0  ;;  %v917_v27 = vadd.f32 %v813_v0, %v431_v60  ;;  %v1090_v29 = vadd.f32 1e-05, %v980_v10  ;;  %v971_v30 = vsel %vm944_vm1, 0.0, %v2095_v21 }
 0x152   : > { %v816_v31 = vrot.slane %v676_v25, 1  ;;  %1007 = vadd.xlane.f32.xlu0 %v991_v12  ;;  %1629 = vlog2.f32 %v1088_v62  ;;  %v961_v12 = vmul.f32 %v914_v7, %v914_v7 }
 0x153   : > { %v2108_v34 = vpop.f32.mrf.mxu1  ;;  %v445_v37 = vpop.f32.mrf.mxu0  ;;  %v2110_v38 = vmul.f32 %v917_v27, %v917_v27  ;;  %1631 = vlog2.f32 %v1089_v8 }
 0x154   : > { %v817_v40 = vsel %vm779_vm0, %v812_v16, %v816_v31  ;;  %v818_v58 = vrot.slane %v2108_v34, 1  ;;  %v814_v16 = vrot.slane %v2091_v19, 1  ;;  %1633 = vlog2.f32 %v1090_v29 }
 0x155   : > { %v682_v36 = vpop.f32.mrf.mxu1  ;;  %v992_v43 = vsel %vm944_vm1, %v2110_v38, 0.0  ;;  %v447_v44 = vpop.f32.mrf.mxu0  ;;  %v919_v45 = vadd.f32 %v817_v40, %v437_v9  ;;  %v810_v9 = vrot.slane %v2076_v2, 1  ;;  %v2139_v2 = vmul.f32 0.6931472, %v1624_v6 }
 0x156   : > { %v820_v49 = vrot.slane %v682_v36, 1  ;;  %1009 = vadd.xlane.f32.xlu0 %v992_v43 }
 0x157   : > { %v684_v53 = vpop.f32.mrf.mxu1  ;;  %v449_v54 = vpop.f32.mrf.mxu0  ;;  %v2118_v56 = vmul.f32 %v919_v45, %v919_v45  ;;  %v811_v28 = vsel %vm779_vm0, %v806_v11, %v810_v9 }
 0x158   : > { %v822_v59 = vrot.slane %v684_v53, 1  ;;  %v821_v60 = vsel %vm779_vm0, %v816_v31, %v820_v49  ;;  %v916_v45 = vadd.f32 %v811_v28, %v2066_v47  ;;  %v981_v53 = vadd.f32 %v971_v30, %v961_v12 }
 0x159   : > { %v686_v63 = vpop.f32.mrf.mxu1  ;;  %v993_v1 = vsel %vm944_vm1, %v2118_v56, 0.0  ;;  %v451_v4 = vpop.f32.mrf.mxu0  ;;  %v921_v5 = vadd.f32 %v821_v60, %v441_v26 }
 0x15a   : > { %v823_v3 = vsel %vm779_vm0, %v818_v58, %v822_v59  ;;  %v824_v50 = vrot.slane %v686_v63, 1  ;;  %1011 = vadd.xlane.f32.xlu0 %v993_v1  ;;  %v1626_v60 = vpop.eup %1625  ;;  %v962_v8 = vmul.f32 %v916_v45, %v916_v45 }
 0x15b   : > { %v690_v13 = vpop.f32.mrf.mxu1  ;;  %v455_v14 = vpop.f32.mrf.mxu0  ;;  %v2132_v15 = vmul.f32 %v921_v5, %v921_v5  ;;  %v922_v17 = vadd.f32 %v823_v3, %v445_v37  ;;  %v815_v37 = vsel %vm779_vm0, %v810_v9, %v814_v16  ;;  %v1091_v9 = vadd.f32 1e-05, %v981_v53 }
 0x15c   : > { %v826_v18 = vrot.slane %v690_v13, 1  ;;  %v825_v35 = vsel %vm779_vm0, %v820_v49, %v824_v50  ;;  %v918_v52 = vadd.f32 %v815_v37, %v2078_v57  ;;  %v2166_v12 = vmul.f32 0.6931472, %v1626_v60 }
 0x15d   : > { %v692_v23 = vpop.f32.mrf.mxu1  ;;  %v994_v0 = vsel %vm944_vm1, %v2132_v15, 0.0  ;;  %v457_v24 = vpop.f32.mrf.mxu0  ;;  %v923_v25 = vadd.f32 %v825_v35, %v447_v44  ;;  %v1025_v39 = vmul.f32 %v922_v17, %v922_v17 }
 0x15e   : > { %v827_v26 = vsel %vm779_vm0, %v822_v59, %v826_v18  ;;  %v828_v27 = vrot.slane %v692_v23, 1  ;;  %1013 = vadd.xlane.f32.xlu0 %v994_v0  ;;  %v2163_v35 = vpop.eup %1627 }
 0x15f   : > { %v694_v31 = vpop.f32.mrf.mxu1  ;;  %v459_v32 = vpop.f32.mrf.mxu0  ;;  %v1015_v33 = vmul.f32 %v923_v25, %v923_v25  ;;  %v924_v42 = vadd.f32 %v827_v26, %v449_v54 }
 0x160   : > { %v830_v40 = vrot.slane %v694_v31, 1  ;;  %v829_v41 = vsel %vm779_vm0, %v824_v50, %v828_v27  ;;  %v2174_v31 = vpop.eup %1629 }
 0x161   : > { %v696_v36 = vpop.f32.mrf.mxu1  ;;  %v1055_v11 = vsel %vm944_vm1, %v1015_v33, 0.0  ;;  %v1035_v43 = vsel %vm944_vm1, 0.0, %v1015_v33  ;;  %v461_v21 = vpop.f32.mrf.mxu0  ;;  %v925_v44 = vadd.f32 %v829_v41, %v451_v4  ;;  %v1026_v4 = vmul.f32 %v924_v42, %v924_v42 }
 0x162   : > { %v831_v46 = vsel %vm779_vm0, %v826_v18, %v830_v40  ;;  %v832_v49 = vrot.slane %v696_v36, 1  ;;  %1065 = vadd.xlane.f32.xlu1 %v1055_v11  ;;  %v1045_v51 = vadd.f32 %v1035_v43, %v1025_v39  ;;  %v819_v41 = vsel %vm779_vm0, %v814_v16, %v818_v58 }
 0x163   : > { %v700_v54 = vpop.f32.mrf.mxu1  ;;  %v465_v22 = vpop.f32.mrf.mxu0  ;;  %v1016_v59 = vmul.f32 %v925_v44, %v925_v44  ;;  %v926_v61 = vadd.f32 %v831_v46, %v455_v14 }
 0x164   : > { %v1115_v62 = vadd.f32 1e-05, %v1045_v51  ;;  %v834_v63 = vrot.slane %v700_v54, 1  ;;  %v833_v1 = vsel %vm779_vm0, %v828_v27, %v832_v49 }
 0x165   : > { %v702_v47 = vpop.f32.mrf.mxu1  ;;  %v1056_v5 = vsel %vm944_vm1, %v1016_v59, 0.0  ;;  %v1036_v6 = vsel %vm944_vm1, 0.0, %v1016_v59  ;;  %v467_v7 = vpop.f32.mrf.mxu0  ;;  %v927_v57 = vadd.f32 %v833_v1, %v457_v24  ;;  %v1027_v23 = vmul.f32 %v926_v61, %v926_v61 }
 0x166   : > { %1635 = vlog2.f32 %v1115_v62  ;;  %v835_v3 = vsel %vm779_vm0, %v830_v40, %v834_v63  ;;  %v836_v50 = vrot.slane %v702_v47, 1  ;;  %1067 = vadd.xlane.f32.xlu1 %v1056_v5  ;;  %v1046_v13 = vadd.f32 %v1036_v6, %v1026_v4  ;;  %v2180_v40 = vpop.eup %1631 }
 0x167   : > { %v928_v10 = vadd.f32 %v835_v3, %v459_v32  ;;  %v704_v14 = vpop.f32.mrf.mxu1  ;;  %v469_v17 = vpop.f32.mrf.mxu0  ;;  %v1017_v18 = vmul.f32 %v927_v57, %v927_v57  ;;  %v2168_v24 = vmul.f32 %v918_v52, %v918_v52  ;;  %v972_v32 = vsel %vm944_vm1, 0.0, %v2110_v38 }
 0x168   : > { %v838_v0 = vrot.slane %v704_v14, 1  ;;  %v837_v25 = vsel %vm779_vm0, %v832_v49, %v836_v50  ;;  %v1116_v36 = vadd.f32 1e-05, %v1046_v13  ;;  %v982_v49 = vadd.f32 %v972_v32, %v962_v8 }
 0x169   : > { %v706_v26 = vpop.f32.mrf.mxu1  ;;  %v1057_v27 = vsel %vm944_vm1, %v1017_v18, 0.0  ;;  %v1037_v28 = vsel %vm944_vm1, 0.0, %v1017_v18  ;;  %v471_v29 = vpop.f32.mrf.mxu0  ;;  %v929_v30 = vadd.f32 %v837_v25, %v461_v21  ;;  %v1028_v42 = vmul.f32 %v928_v10, %v928_v10 }
 0x16a   : > { %v839_v33 = vsel %vm779_vm0, %v834_v63, %v838_v0  ;;  %v840_v37 = vrot.slane %v706_v26, 1  ;;  %1069 = vadd.xlane.f32.xlu1 %v1057_v27  ;;  %v1047_v39 = vadd.f32 %v1037_v28, %v1027_v23  ;;  %v2196_v63 = vpop.eup %1633  ;;  %v2203_v3 = vadd.f32 1e-05, %v982_v49 }
 0x16b   : > { %v710_v11 = vpop.f32.mrf.mxu1  ;;  %v475_v43 = vpop.f32.mrf.mxu0  ;;  %v1018_v21 = vmul.f32 %v929_v30, %v929_v30  ;;  %v930_v44 = vadd.f32 %v839_v33, %v465_v22  ;;  %v2194_v22 = vadd.f32 %v819_v41, %v2093_v20  ;;  %v973_v14 = vsel %vm944_vm1, 0.0, %v2118_v56 }
 0x16c   : > { %v1117_v38 = vadd.f32 1e-05, %v1047_v39  ;;  %v842_v45 = vrot.slane %v710_v11, 1  ;;  %v841_v46 = vsel %vm779_vm0, %v836_v50, %v840_v37  ;;  %v974_v11 = vsel %vm944_vm1, 0.0, %v2132_v15 }
 0x16d   : > { %v712_v51 = vpop.f32.mrf.mxu1  ;;  %v1058_v52 = vsel %vm944_vm1, %v1018_v21, 0.0  ;;  %v1038_v19 = vsel %vm944_vm1, 0.0, %v1018_v21  ;;  %v477_v34 = vpop.f32.mrf.mxu0  ;;  %v931_v58 = vadd.f32 %v841_v46, %v467_v7  ;;  %v1029_v1 = vmul.f32 %v930_v44, %v930_v44 }
 0x16e   : > { %1637 = vlog2.f32 %v1117_v38  ;;  %v843_v16 = vsel %vm779_vm0, %v838_v0, %v842_v45  ;;  %v844_v53 = vrot.slane %v712_v51, 1  ;;  %1071 = vadd.xlane.f32.xlu1 %v1058_v52  ;;  %v1048_v54 = vadd.f32 %v1038_v19, %v1028_v42 }
 0x16f   : > { %1639 = vlog2.f32 %v1091_v9  ;;  %v932_v59 = vadd.f32 %v843_v16, %v469_v17  ;;  %v714_v60 = vpop.f32.mrf.mxu1  ;;  %v479_v61 = vpop.f32.mrf.mxu0  ;;  %v1019_v62 = vmul.f32 %v931_v58, %v931_v58 }
 0x170   : > { %1641 = vlog2.f32 %v1116_v36  ;;  %v846_v4 = vrot.slane %v714_v60, 1  ;;  %v845_v47 = vsel %vm779_vm0, %v840_v37, %v844_v53  ;;  %v1118_v5 = vadd.f32 1e-05, %v1048_v54 }
 0x171   : > { %v716_v6 = vpop.f32.mrf.mxu1  ;;  %v1059_v7 = vsel %vm944_vm1, %v1019_v62, 0.0  ;;  %v1039_v20 = vsel %vm944_vm1, 0.0, %v1019_v62  ;;  %v481_v57 = vpop.f32.mrf.mxu0  ;;  %v933_v8 = vadd.f32 %v845_v47, %v471_v29  ;;  %v1030_v17 = vmul.f32 %v932_v59, %v932_v59 }
 0x172   : > { %v847_v50 = vsel %vm779_vm0, %v842_v45, %v846_v4  ;;  %v848_v9 = vrot.slane %v716_v6, 1  ;;  %1073 = vadd.xlane.f32.xlu1 %v1059_v7  ;;  %v1049_v10 = vadd.f32 %v1039_v20, %v1029_v1  ;;  %1643 = vlog2.f32 %v1118_v5 }
 0x173   : > { %v1636_v13 = vpop.eup %1635  ;;  %v934_v18 = vadd.f32 %v847_v50, %v475_v43  ;;  %v720_v23 = vpop.f32.mrf.mxu1  ;;  %v1020_v25 = vmul.f32 %v933_v8, %v933_v8  ;;  %v983_v36 = vadd.f32 %v973_v14, %v2168_v24  ;;  %v964_v59 = vmul.f32 %v2194_v22, %v2194_v22 }
 0x174   : > { %v485_v0 = vpop.f32.mrf.mxu0  ;;  %v1119_v26 = vadd.f32 1e-05, %v1049_v10  ;;  %v850_v27 = vrot.slane %v720_v23, 1  ;;  %v1126_v28 = vmul.f32 0.6931472, %v1636_v13  ;;  %v849_v29 = vsel %vm779_vm0, %v844_v53, %v848_v9 }
 0x175   : > { %v722_v30 = vpop.f32.mrf.mxu1  ;;  %v1060_v32 = vsel %vm944_vm1, %v1020_v25, 0.0  ;;  %v1040_v33 = vsel %vm944_vm1, 0.0, %v1020_v25  ;;  %v935_v56 = vadd.f32 %v849_v29, %v477_v34  ;;  %v1031_v45 = vmul.f32 %v934_v18, %v934_v18 }
 0x176   : > { %v487_v37 = vpop.f32.mrf.mxu0  ;;  %1645 = vlog2.f32 %v1119_v26  ;;  %v851_v39 = vsel %vm779_vm0, %v846_v4, %v850_v27  ;;  %v852_v41 = vrot.slane %v722_v30, 1  ;;  %1075 = vadd.xlane.f32.xlu1 %v1060_v32  ;;  %v1050_v42 = vadd.f32 %v1040_v33, %v1030_v17 }
 0x177   : > { %v724_v43 = vpop.f32.mrf.mxu1  ;;  %v1145_v44 = vsub.f32 %v2139_v2, %v1126_v28  ;;  %v1021_v38 = vmul.f32 %v935_v56, %v935_v56  ;;  %v936_v52 = vadd.f32 %v851_v39, %v479_v61  ;;  %v1093_v60 = vadd.f32 1e-05, %v983_v36 }
 0x178   : > { %v489_v21 = vpop.f32.mrf.mxu0  ;;  %v1120_v46 = vadd.f32 1e-05, %v1050_v42  ;;  %v854_v49 = vrot.slane %v724_v43, 1  ;;  %v853_v51 = vsel %vm779_vm0, %v848_v9, %v852_v41  ;;  %v984_v50 = vadd.f32 %v974_v11, %v964_v59 }
 0x179   : > { %v726_v19 = vpop.f32.mrf.mxu1  ;;  %v1225_v34 = vmul.f32 %v1145_v44, %v1145_v44  ;;  %v1061_v24 = vsel %vm944_vm1, %v1021_v38, 0.0  ;;  %v1041_v58 = vsel %vm944_vm1, 0.0, %v1021_v38  ;;  %v937_v1 = vadd.f32 %v853_v51, %v481_v57 }
 0x17a   : > { %v491_v15 = vpop.f32.mrf.mxu0  ;;  %1647 = vlog2.f32 %v1120_v46  ;;  %v855_v16 = vsel %vm779_vm0, %v850_v27, %v854_v49  ;;  %v856_v2 = vrot.slane %v726_v19, 1  ;;  %1077 = vadd.xlane.f32.xlu1 %v1061_v24  ;;  %v1051_v53 = vadd.f32 %v1041_v58, %v1031_v45 }
 0x17b   : > { %v1638_v54 = vpop.eup %1637  ;;  %v938_v61 = vadd.f32 %v855_v16, %v485_v0  ;;  %1235 = vadd.xlane.f32.xlu0 %v1225_v34  ;;  %v730_v62 = vpop.f32.mrf.mxu1  ;;  %v1032_v9 = vmul.f32 %v936_v52, %v936_v52  ;;  %v1022_v13 = vmul.f32 %v937_v1, %v937_v1  ;;  %v1094_v38 = vadd.f32 1e-05, %v984_v50 }
 0x17c   : > { %v495_v4 = vpop.f32.mrf.mxu0  ;;  %v2228_v47 = vpop.eup %1639  ;;  %v1121_v5 = vadd.f32 1e-05, %v1051_v53  ;;  %v858_v6 = vrot.slane %v730_v62, 1  ;;  %v1130_v7 = vmul.f32 0.6931472, %v1638_v54  ;;  %v857_v20 = vsel %vm779_vm0, %v852_v41, %v856_v2 }
 0x17d   : > { %v1642_v8 = vpop.eup %1641  ;;  %v732_v10 = vpop.f32.mrf.mxu1  ;;  %v939_v14 = vadd.f32 %v857_v20, %v487_v37  ;;  %v1033_v23 = vmul.f32 %v938_v61, %v938_v61  ;;  %v1062_v0 = vsel %vm944_vm1, %v1022_v13, 0.0  ;;  %v1042_v25 = vsel %vm944_vm1, 0.0, %v1022_v13 }
 0x17e   : > { %v496_v22 = vpop.f32.mrf.mxu0  ;;  %1649 = vlog2.f32 %v1121_v5  ;;  %v859_v17 = vsel %vm779_vm0, %v854_v49, %v858_v6  ;;  %v860_v18 = vrot.slane %v732_v10, 1  ;;  %v1147_v57 = vsub.f32 %v2166_v12, %v1130_v7  ;;  %1079 = vadd.xlane.f32.xlu1 %v1062_v0 }
 0x17f   : > { %v734_v26 = vpop.f32.mrf.mxu1  ;;  %v1023_v27 = vmul.f32 %v939_v14, %v939_v14  ;;  %v940_v29 = vadd.f32 %v859_v17, %v489_v21  ;;  %v1052_v30 = vadd.f32 %v1042_v25, %v1032_v9  ;;  %v1128_v41 = vmul.f32 0.6931472, %v1642_v8  ;;  %v1644_v36 = vpop.eup %1643 }
 0x180   : > { %v497_v28 = vpop.f32.mrf.mxu0  ;;  %v1227_v32 = vmul.f32 %v1147_v57, %v1147_v57  ;;  %v861_v33 = vsel %vm779_vm0, %v856_v2, %v860_v18  ;;  %1651 = vlog2.f32 %v2203_v3  ;;  %v1098_v21 = vmul.f32 0.6931472, %v2163_v35 }
 0x181   : > { %v735_v37 = vpop.f32.mrf.mxu1  ;;  %v1063_v12 = vsel %vm944_vm1, %v1023_v27, 0.0  ;;  %v1043_v56 = vsel %vm944_vm1, 0.0, %v1023_v27  ;;  %v941_v39 = vadd.f32 %v861_v33, %v491_v15  ;;  %v1122_v11 = vadd.f32 1e-05, %v1052_v30 }
 0x182   : > { %v498_v42 = vpop.f32.mrf.mxu0  ;;  %1239 = vadd.xlane.f32.xlu0 %v1227_v32  ;;  %v1053_v43 = vadd.f32 %v1043_v56, %v1033_v23  ;;  %1653 = vlog2.f32 %v1093_v60  ;;  %v1104_v46 = vmul.f32 0.6931472, %v2180_v40  ;;  %v1034_v49 = vmul.f32 %v940_v29, %v940_v29  ;;  %1081 = vadd.xlane.f32.xlu1 %v1063_v12 }
 0x183   : > { %v1646_v44 = vpop.eup %1645  ;;  %v1024_v45 = vmul.f32 %v941_v39, %v941_v39  ;;  %1655 = vlog2.f32 %v1122_v11  ;;  %v1146_v34 = vsub.f32 %v1098_v21, %v1128_v41  ;;  %v1132_v58 = vmul.f32 0.6931472, %v1644_v36 }
 0x184   : > { %v1123_v51 = vadd.f32 1e-05, %v1053_v43  ;;  %v1134_v52 = vmul.f32 0.6931472, %v1646_v44  ;;  %v1102_v2 = vmul.f32 0.6931472, %v2174_v31 }
 0x185   : > { %v1064_v19 = vsel %vm944_vm1, %v1024_v45, 0.0  ;;  %v1044_v3 = vsel %vm944_vm1, 0.0, %v1024_v45  ;;  %v1226_v53 = vmul.f32 %v1146_v34, %v1146_v34  ;;  %v1108_v61 = vmul.f32 0.6931472, %v2228_v47 }
 0x186   : > { %1657 = vlog2.f32 %v1123_v51  ;;  %v1054_v35 = vadd.f32 %v1044_v3, %v1034_v49  ;;  %v1149_v24 = vsub.f32 %v1104_v46, %v1134_v52  ;;  %1083 = vadd.xlane.f32.xlu1 %v1064_v19  ;;  %v1148_v54 = vsub.f32 %v1102_v2, %v1132_v58 }
 0x187   : > { %v1648_v15 = vpop.eup %1647  ;;  %1659 = vlog2.f32 %v1094_v38  ;;  %v1106_v1 = vmul.f32 0.6931472, %v2196_v63 }
 0x188   : > { %v1124_v40 = vadd.f32 1e-05, %v1054_v35  ;;  %v1229_v16 = vmul.f32 %v1149_v24, %v1149_v24  ;;  %v1136_v59 = vmul.f32 0.6931472, %v1648_v15  ;;  %v1228_v4 = vmul.f32 %v1148_v54, %v1148_v54 }
 0x18a   : > { %1661 = vlog2.f32 %v1124_v40  ;;  %1243 = vadd.xlane.f32.xlu0 %v1229_v16  ;;  %1237 = vadd.xlane.f32.xlu1 %v1226_v53  ;;  %v1150_v6 = vsub.f32 %v1106_v1, %v1136_v59 }
 0x18b   : > { %v1650_v60 = vpop.eup %1649 }
 0x18c   : > { %v1138_v62 = vmul.f32 0.6931472, %v1650_v60  ;;  %v1230_v50 = vmul.f32 %v1150_v6, %v1150_v6 }
 0x18d   : > { %v1652_v7 = vpop.eup %1651 }
 0x18e   : > { %v1151_v5 = vsub.f32 %v1108_v61, %v1138_v62  ;;  %1241 = vadd.xlane.f32.xlu1 %v1228_v4  ;;  %v1110_v9 = vmul.f32 0.6931472, %v1652_v7 }
 0x18f   : > { %v1654_v20 = vpop.eup %1653 }
 0x190   : > { %v1231_v8 = vmul.f32 %v1151_v5, %v1151_v5  ;;  %v1656_v31 = vpop.eup %1655  ;;  %v1112_v22 = vmul.f32 0.6931472, %v1654_v20 }
 0x191   : > { %v1140_v10 = vmul.f32 0.6931472, %v1656_v31 }
 0x192   : > { %1247 = vadd.xlane.f32.xlu0 %v1231_v8  ;;  %1245 = vadd.xlane.f32.xlu1 %v1230_v50 }
 0x193   : > { %v1658_v13 = vpop.eup %1657  ;;  %v1152_v14 = vsub.f32 %v1110_v9, %v1140_v10 }
 0x194   : > { %v1142_v47 = vmul.f32 0.6931472, %v1658_v13  ;;  %v1660_v17 = vpop.eup %1659 }
 0x195   : > { %v1232_v18 = vmul.f32 %v1152_v14, %v1152_v14  ;;  %v1114_v0 = vmul.f32 0.6931472, %v1660_v17  ;;  %v2253_v14 = vshrl.u32 %v942_v48, 7 }
 0x196   : > { %v1153_v63 = vsub.f32 %v1112_v22, %v1142_v47 }
 0x197   : > { %v1662_v57 = vpop.eup %1661  ;;  %1249 = vadd.xlane.f32.xlu1 %v1232_v18 }
 0x198   : > { %v1233_v23 = vmul.f32 %v1153_v63, %v1153_v63  ;;  %v1144_v25 = vmul.f32 0.6931472, %v1662_v57  ;;  %v2256_v63 = vadd.s32 4294967280, %v2017_v55 }
 0x19a   : > { %1251 = vadd.xlane.f32.xlu0 %v1233_v23  ;;  %v1154_v26 = vsub.f32 %v1114_v0, %v1144_v25  ;;  %v2259_v25 = vadd.s32 4294967264, %v2017_v55 }
 0x19c   : > { %v1234_v27 = vmul.f32 %v1154_v26, %v1154_v26  ;;  %v1290_v26 = vadd.s32 4294967288, %v2017_v55 }
 0x19e   : > { %1253 = vadd.xlane.f32.xlu1 %v1234_v27 }
 0x1c3   : > { %v996_v28 = vpop.xlane.xlu0 %995 }
 0x1c4   : > { %v1155_v21 = vadd.f32 1e-05, %v996_v28 }
 0x1c7   : > { %v998_v29 = vpop.xlane.xlu0 %997 }
 0x1c8   : > { %v1156_v36 = vadd.f32 1e-05, %v998_v29 }
 0x1cb   : > { %v1000_v30 = vpop.xlane.xlu0 %999 }
 0x1cc   : > { %v1157_v46 = vadd.f32 1e-05, %v1000_v30 }
 0x1cf   : > { %v1002_v32 = vpop.xlane.xlu0 %1001 }
 0x1d0   : > { %v1158_v49 = vadd.f32 1e-05, %v1002_v32 }
 0x1d3   : > { %v1004_v37 = vpop.xlane.xlu0 %1003 }
 0x1d4   : > { %v1159_v52 = vadd.f32 1e-05, %v1004_v37 }
 0x1d7   : > { %v1006_v56 = vpop.xlane.xlu0 %1005 }
 0x1d8   : > { %v1160_v35 = vadd.f32 1e-05, %v1006_v56 }
 0x1db   : > { %v1008_v11 = vpop.xlane.xlu0 %1007 }
 0x1dc   : > { %v1161_v40 = vadd.f32 1e-05, %v1008_v11 }
 0x1df   : > { %v1010_v51 = vpop.xlane.xlu0 %1009 }
 0x1e0   : > { %v1162_v16 = vadd.f32 1e-05, %v1010_v51 }
 0x1e3   : > { %v1012_v58 = vpop.xlane.xlu0 %1011 }
 0x1e4   : > { %v1163_v60 = vadd.f32 1e-05, %v1012_v58 }
 0x1e7   : > { %v1014_v61 = vpop.xlane.xlu0 %1013 }
 0x1e8   : > { %v1164_v20 = vadd.f32 1e-05, %v1014_v61 }
 0x1eb   : > { %v1066_v33 = vpop.xlane.xlu1 %1065 }
 0x1ec   : > { %v1185_v43 = vadd.f32 1e-05, %v1066_v33  ;;  %v1288_v33 = vsub.s32 %v2017_v55, %v2253_v14 }
 0x1ef   : > { %v1068_v12 = vpop.xlane.xlu1 %1067 }
 0x1f0   : > { %v1186_v41 = vadd.f32 1e-05, %v1068_v12  ;;  %v1304_v12 = vadd.s32 4294967272, %v2017_v55 }
 0x1f2   : > { %1663 = vlog2.f32 %v1186_v41 }
 0x1f3   : > { %v1070_v39 = vpop.xlane.xlu1 %1069  ;;  %1665 = vlog2.f32 %v1156_v36 }
 0x1f4   : > { %v1187_v44 = vadd.f32 1e-05, %v1070_v39  ;;  %1667 = vlog2.f32 %v1185_v43  ;;  %v1300_v43 = vsub.s32 %v2256_v63, %v2253_v14 }
 0x1f5   : > { %1669 = vlog2.f32 %v1155_v21  ;;  %v1293_v21 = vsub.s32 %v1290_v26, %v2253_v14 }
 0x1f6   : > { %1671 = vlog2.f32 %v1187_v44 }
 0x1f7   : > { %v1072_v42 = vpop.xlane.xlu1 %1071 }
 0x1f8   : > { %v1188_v45 = vadd.f32 1e-05, %v1072_v42 }
 0x1fa   : > { %1673 = vlog2.f32 %v1188_v45 }
 0x1fb   : > { %v1074_v38 = vpop.xlane.xlu1 %1073  ;;  %1675 = vlog2.f32 %v1157_v46 }
 0x1fc   : > { %v1189_v34 = vadd.f32 1e-05, %v1074_v38  ;;  %1677 = vlog2.f32 %v1158_v49  ;;  %v1314_v49 = vsub.s32 %v2259_v25, %v2253_v14 }
 0x1fd   : > { %1679 = vlog2.f32 %v1159_v52 }
 0x1ff   : > { %v1076_v19 = vpop.xlane.xlu1 %1075  ;;  %v1664_v2 = vpop.eup %1663 }
 0x200   : > { %v1190_v3 = vadd.f32 1e-05, %v1076_v19  ;;  %v1666_v53 = vpop.eup %1665  ;;  %v1198_v4 = vmul.f32 0.6931472, %v1664_v2 }
 0x201   : > { %v1668_v59 = vpop.eup %1667  ;;  %v1168_v7 = vmul.f32 0.6931472, %v1666_v53 }
 0x202   : > { %1681 = vlog2.f32 %v1190_v3  ;;  %v1670_v1 = vpop.eup %1669  ;;  %v1196_v8 = vmul.f32 0.6931472, %v1668_v59 }
 0x203   : > { %v1078_v24 = vpop.xlane.xlu1 %1077  ;;  %1683 = vlog2.f32 %v1189_v34  ;;  %v1672_v5 = vpop.eup %1671  ;;  %v1166_v13 = vmul.f32 0.6931472, %v1670_v1  ;;  %v1216_v22 = vsub.f32 %v1168_v7, %v1198_v4 }
 0x204   : > { %v1191_v15 = vadd.f32 1e-05, %v1078_v24  ;;  %1685 = vlog2.f32 %v1160_v35  ;;  %v1200_v17 = vmul.f32 0.6931472, %v1672_v5  ;;  %v1236_v29 = vpop.xlane.xlu0 %1235  ;;  %v1307_v35 = vsub.s32 %v1304_v12, %v2253_v14 }
 0x205   : > { %v1215_v23 = vsub.f32 %v1166_v13, %v1196_v8  ;;  %v1256_v37 = vmul.f32 %v1216_v22, %v1216_v22 }
 0x206   : > { %1687 = vlog2.f32 %v1191_v15  ;;  %v1325_v15 = vadd.s32 4294967248, %v2017_v55 }
 0x207   : > { %1689 = vlog2.f32 %v1161_v40  ;;  %v1080_v54 = vpop.xlane.xlu1 %1079  ;;  %v1674_v6 = vpop.eup %1673  ;;  %v1255_v11 = vmul.f32 %v1215_v23, %v1215_v23 }
 0x208   : > { %1691 = vlog2.f32 %v1162_v16  ;;  %v1192_v62 = vadd.f32 1e-05, %v1080_v54  ;;  %v1676_v50 = vpop.eup %1675  ;;  %v1202_v18 = vmul.f32 0.6931472, %v1674_v6  ;;  %v1328_v8 = vsub.s32 %v1325_v15, %v2253_v14 }
 0x209   : > { %v1678_v10 = vpop.eup %1677  ;;  %v1170_v48 = vmul.f32 0.6931472, %v1676_v50  ;;  %v1265_v3 = vadd.f32 %v1255_v11, %v1236_v29 }
 0x20a   : > { %1693 = vlog2.f32 %v1192_v62  ;;  %v1680_v47 = vpop.eup %1679  ;;  %v1172_v28 = vmul.f32 0.6931472, %v1678_v10 }
 0x20b   : > { %v1082_v31 = vpop.xlane.xlu1 %1081  ;;  %1695 = vlog2.f32 %v1163_v60  ;;  %v1217_v41 = vsub.f32 %v1170_v48, %v1200_v17  ;;  %v1240_v46 = vpop.xlane.xlu0 %1239  ;;  %v1174_v19 = vmul.f32 0.6931472, %v1680_v47  ;;  %v1318_v60 = vadd.s32 4294967256, %v2017_v55 }
 0x20c   : > { %v1193_v9 = vadd.f32 1e-05, %v1082_v31  ;;  %v1218_v42 = vsub.f32 %v1172_v28, %v1202_v18  ;;  %v1289_v7 = vrot.slane %v1265_v3, %v1288_v33  ;;  %v1339_v28 = vadd.s32 4294967232, %v2017_v55 }
 0x20d   : > { %v1257_v24 = vmul.f32 %v1217_v41, %v1217_v41  ;;  %v1321_v17 = vsub.s32 %v1318_v60, %v2253_v14 }
 0x20e   : > { %1697 = vlog2.f32 %v1193_v9  ;;  %v1258_v58 = vmul.f32 %v1218_v42, %v1218_v42  ;;  %v1332_v9 = vadd.s32 4294967240, %v2017_v55  ;;  %v1346_v42 = vadd.s32 4294967224, %v2017_v55 }
 0x20f   : > { %v1682_v57 = vpop.eup %1681  ;;  %1699 = vlog2.f32 %v1164_v20  ;;  %v1084_v0 = vpop.xlane.xlu1 %1083  ;;  %v1267_v1 = vadd.f32 %v1257_v24, %v1240_v46 }
 0x210   : > { %v1684_v27 = vpop.eup %1683  ;;  %v1194_v30 = vadd.f32 1e-05, %v1084_v0  ;;  %v1206_v39 = vmul.f32 0.6931472, %v1682_v57  ;;  %v1349_v24 = vsub.s32 %v1346_v42, %v2253_v14 }
 0x211   : > { %v1686_v32 = vpop.eup %1685  ;;  %v1204_v36 = vmul.f32 0.6931472, %v1684_v27  ;;  %v1301_v23 = vrot.slane %v1267_v1, %v1300_v43 }
 0x212   : > { %1701 = vlog2.f32 %v1194_v30  ;;  %v1176_v45 = vmul.f32 0.6931472, %v1686_v32  ;;  %v1335_v32 = vsub.s32 %v1332_v9, %v2253_v14 }
 0x213   : > { %v1688_v56 = vpop.eup %1687  ;;  %v1238_v44 = vpop.xlane.xlu1 %1237  ;;  %v1219_v53 = vsub.f32 %v1174_v19, %v1204_v36 }
 0x214   : > { %v1690_v38 = vpop.eup %1689  ;;  %v1266_v51 = vadd.f32 %v1256_v37, %v1238_v44  ;;  %v1208_v34 = vmul.f32 0.6931472, %v1688_v56  ;;  %v1220_v40 = vsub.f32 %v1176_v45, %v1206_v39  ;;  %v1244_v4 = vpop.xlane.xlu0 %1243 }
 0x215   : > { %v1692_v52 = vpop.eup %1691  ;;  %v1178_v2 = vmul.f32 0.6931472, %v1690_v38  ;;  %v1259_v13 = vmul.f32 %v1219_v53, %v1219_v53  ;;  %v1342_v38 = vsub.s32 %v1339_v28, %v2253_v14 }
 0x216   : > { %v1294_v54 = vrot.slane %v1266_v51, %v1293_v21  ;;  %v1180_v61 = vmul.f32 0.6931472, %v1692_v52  ;;  %v1260_v31 = vmul.f32 %v1220_v40, %v1220_v40 }
 0x217   : > { %v1694_v16 = vpop.eup %1693  ;;  %v1242_v59 = vpop.xlane.xlu1 %1241  ;;  %v1221_v20 = vsub.f32 %v1178_v2, %v1208_v34  ;;  %v1269_v27 = vadd.f32 %v1259_v13, %v1244_v4 }
 0x218   : > { %v1210_v62 = vmul.f32 0.6931472, %v1694_v16  ;;  %v1268_v5 = vadd.f32 %v1258_v58, %v1242_v59  ;;  %v1696_v6 = vpop.eup %1695  ;;  %v1296_v22 = vsel %vm1295_vm2, %v1294_v54, %v1289_v7 }
 0x219   : > { %v1182_v57 = vmul.f32 0.6931472, %v1696_v6  ;;  %v1261_v48 = vmul.f32 %v1221_v20, %v1221_v20  ;;  %v1303_v29 = vsel %vm1302_vm3, %v1301_v23, %v1296_v22  ;;  %v1315_v44 = vrot.slane %v1269_v27, %v1314_v49 }
 0x21a   : > { %v1222_v50 = vsub.f32 %v1180_v61, %v1210_v62  ;;  %v1308_v47 = vrot.slane %v1268_v5, %v1307_v35 }
 0x21b   : > { %v1698_v10 = vpop.eup %1697  ;;  %v1246_v18 = vpop.xlane.xlu1 %1245 }
 0x21c   : > { %v1700_v63 = vpop.eup %1699  ;;  %v1212_v0 = vmul.f32 0.6931472, %v1698_v10  ;;  %v1248_v25 = vpop.xlane.xlu0 %1247  ;;  %v1270_v26 = vadd.f32 %v1260_v31, %v1246_v18  ;;  %v1262_v30 = vmul.f32 %v1222_v50, %v1222_v50  ;;  %v1310_v56 = vsel %vm1309_vm4, %v1308_v47, %v1303_v29 }
 0x21d   : > { %v1184_v12 = vmul.f32 0.6931472, %v1700_v63  ;;  %v1271_v39 = vadd.f32 %v1261_v48, %v1248_v25  ;;  %v1317_v19 = vsel %vm1316_vm5, %v1315_v44, %v1310_v56 }
 0x21e   : > { %v1223_v33 = vsub.f32 %v1182_v57, %v1212_v0  ;;  %v1322_v11 = vrot.slane %v1270_v26, %v1321_v17 }
 0x21f   : > { %v1702_v37 = vpop.eup %1701  ;;  %v1329_v52 = vrot.slane %v1271_v39, %v1328_v8 }
 0x220   : > { %v1250_v41 = vpop.xlane.xlu1 %1249  ;;  %v1214_v36 = vmul.f32 0.6931472, %v1702_v37  ;;  %v1263_v21 = vmul.f32 %v1223_v33, %v1223_v33  ;;  %v1324_v3 = vsel %vm1323_vm6, %v1322_v11, %v1317_v19 }
 0x221   : > { %v1272_v43 = vadd.f32 %v1262_v30, %v1250_v41  ;;  %v1331_v40 = vsel %vm1330_vm7, %v1329_v52, %v1324_v3 }
 0x222   : > { %v1224_v51 = vsub.f32 %v1184_v12, %v1214_v36 }
 0x223   : > { %v1252_v45 = vpop.xlane.xlu0 %1251  ;;  %v1336_v34 = vrot.slane %v1272_v43, %v1335_v32 }
 0x224   : > { %v1273_v46 = vadd.f32 %v1263_v21, %v1252_v45  ;;  %v1264_v35 = vmul.f32 %v1224_v51, %v1224_v51 }
 0x225   : > { %v1338_v16 = vsel %vm1337_vm8, %v1336_v34, %v1331_v40 }
 0x226   : > { %v1343_v58 = vrot.slane %v1273_v46, %v1342_v38 }
 0x227   : > { %v1254_v49 = vpop.xlane.xlu1 %1253 }
 0x228   : > { %v1274_v15 = vadd.f32 %v1264_v35, %v1254_v49  ;;  %v1345_v53 = vsel %vm1344_vm9, %v1343_v58, %v1338_v16 }
 0x22a   : > { %v1350_v2 = vrot.slane %v1274_v15, %v1349_v24 }
 0x22c   : > { %v1352_v54 = vsel %vm1351_vm10, %v1350_v2, %v1345_v53 }
 0x22d   : > { %v1354_v14 = vsel %vm1275_vm11, %v1352_v54, 0.0 }
 0x22e   : > { %1356 = vst.msk [vmem:[%s175_s17] sm:$0x1] %vm1355_vm12, %v1354_v14 }
 0x22f   : > { %1770 = shalt.err (!%p1767_p0)
}
 0x230   : > { %s1771_s3 = scalar_lea.hbm %s2291_s20, 16  ;;  %s1775_s6 = scalar_lea.hbm %s2329_s2, 64 }
 0x231   : > { %p1772_p5 = scmp.ne.s32.totalorder %s2291_s20, %s1771_s3  ;;  %p1776_p4 = scmp.lt.s32.totalorder %s2291_s20, %s2329_s2 }
 0x232   : > { %p1777_p6 = scmp.lt.s32.totalorder %s1775_s6, %s1771_s3 }
 0x233   : > { %p1773_p9 = pnand %p1772_p5, %p2345_p10 }
 0x234   : > { %p1778_p8 = por %p1777_p6, %p1776_p4 }
 0x235   : > { %p1774_p1 = pneg %p1773_p9 }
 0x237   : > { %p1779_p3 = pnand %p1778_p8, %p1774_p1 }
 0x239   : > { %1782 = shalt.err (!%p1779_p3)
}
 0x23a   : > { %1508 = dma.vmem_to_hbm [thread:$0]  (%p2345_p10), %s1371_s8, 16, %s2291_s20, %s1358_s25  }
 0x23b PF: > { %p1525_p7 = scmp.ge.s32.totalorder %s1825_s12, 2  ;;  %s1382_s22 = sand.u32 1, %s1813_s9  }
 0x23c   : > { %p2346_p11 = scmp.ne.s32.totalorder %s2335_s16, 0  ;;  %s1383_s23 = scalar_lea.sflag [#allocation4], %s1382_s22 }
 0x23e   : > { %p1519_p12 = pnand %p1525_p7, %p2346_p11 }
 0x240   : > { %p1520_p2 = pneg %p1519_p12 }
 0x242   : > { %1808 = dma.done.wait (%p1520_p2), %s1383_s23, 16  }
 0x243   : > { %1810 = vsyncadd (%p1520_p2), %s1383_s23, 4294967280  ;;  %p16_p13 = scmp.ge.s32.totalorder %s1903_s21, 6   ;;  %s2347_s9 = smov %s1817_s10 }
 0x244   : > { %s2348_s10 = smov %s1821_s11  ;;  %s2349_s11 = smov %s1920_s29 }
 0x245   : > { %s2350_s12 = smov %s1903_s21  ;;  %18 = sbr.rel (!%p16_p13) target bundleno = 6 (0x6), region = 77 }
 0x24a   :  { %1387 = vsyncpa [#allocation3], 1 }
 0x24b   :  { %1389 = vsyncpa [#allocation3 + $0x1], 1 }
 0x24c   :  { %1390 = vsyncpa [#allocation6], 1 }
 0x24d   :  { %1391 = vsyncpa [#allocation4], 1 }
 0x24e   :  { %1393 = vsyncpa [#allocation4 + $0x1], 1 }

</bundles_post_ra>
